<compile_context>
chip_gen: v7x
topology: tpu7x:2x2x1
jax: 0.10.0
libtpu: 0.0.40
codegen_flags: <defaults>
</compile_context>

<pallas_src>
import jax
import jax.numpy as jnp
from jax import lax
from jax.experimental import pallas as pl
from jax.experimental.pallas import tpu as pltpu


def _round_up(x, m):
    return ((x + m - 1) // m) * m


def _embed_kernel(patches_ref, w_ref, add_ref, cls_ref, out_ref):
    # patches_ref: (1, ts, IN) bf16  (seq row 0 of each batch is a dummy zero row)
    # w_ref:       (tn, IN)    bf16  (row-major nn.Linear weight tile)
    # add_ref:     (1, 1, tn)  f32   bias + pos_embedding
    # cls_ref:     (1, 1, tn)  f32   class_token + pos_embedding
    # out_ref:     (1, ts, tn) f32
    proj = lax.dot_general(
        patches_ref[0], w_ref[...],
        dimension_numbers=(((1,), (1,)), ((), ())),   # contract IN with IN
        preferred_element_type=jnp.float32,
    )                                                 # (ts, tn), f32 accumulate
    out_ref[0] = (proj + add_ref[0]).astype(out_ref.dtype)

    # Sequence row 0 (only present in the first seq tile) is the class token.
    @pl.when(pl.program_id(1) == 0)
    def _():
        out_ref[0, :1, :] = cls_ref[0].astype(out_ref.dtype)


def _patchify(x, patch_size):
    # 'b c (h h1) (w w1) -> b (h w) (h1 w1 c)'
    B, C, H, W = x.shape
    p = patch_size
    h, w = H // p, W // p
    x = x.reshape(B, C, h, p, w, p)
    x = x.transpose(0, 2, 4, 3, 5, 1)                 # (B, h, w, h1, w1, c)
    return x.reshape(B, h * w, p * p * C)             # (B, N, IN)


def input_embedding(x, weight, bias, class_token, pos_embedding, patch_size):
    """Replicates InputEmbedding.forward.

    x:             (B, C, H, W)  float32
    weight:        (D, IN)       nn.Linear weight, IN = patch^2 * C
    bias:          (D,)
    class_token:   (B, 1, D)
    pos_embedding: (B, 1, D)
    returns:       (B, N+1, D)   float32
    """
    B = x.shape[0]
    D, IN = weight.shape

    patches = _patchify(x, patch_size)                # (B, N, IN)
    N = patches.shape[1]
    S = N + 1                                         # sequence incl. class token

    # Dummy zero row at seq position 0 (class-token slot); matmul inputs -> bf16.
    patches_ext = jnp.pad(patches, ((0, 0), (1, 0), (0, 0))).astype(jnp.bfloat16)

    # Pad D to a lane-dense multiple of 128 so output stores are unmasked.
    Dp = _round_up(D, 128)
    pad_d = Dp - D
    w = weight if pad_d == 0 else jnp.pad(weight, ((0, pad_d), (0, 0)))
    w = w.astype(jnp.bfloat16)                        # (Dp, IN); no weight.T in HBM

    add = bias[None, None, :] + pos_embedding         # (B, 1, D)  bias+pos fused
    cls = class_token + pos_embedding                 # (B, 1, D)  class-token row
    if pad_d:
        add = jnp.pad(add, ((0, 0), (0, 0), (0, pad_d)))
        cls = jnp.pad(cls, ((0, 0), (0, 0), (0, pad_d)))

    # Tile sizes: lane dim tn in {128, 256}; seq tiled only when it divides
    # cleanly (otherwise one full-sequence block, legal since it == full dim).
    tn = 256 if Dp % 256 == 0 else 128
    if S % 256 == 0:
        ts = 256
    elif S % 128 == 0:
        ts = 128
    else:
        ts = S
    grid = (B, S // ts, Dp // tn)
    # TODO(synk): for very large IN (K) on v7x, add a K grid axis + f32 VMEM
    # accumulator; ViT-scale IN (<=3072) fits comfortably untiled.

    flops = 2 * B * S * IN * Dp
    bytes_accessed = (patches_ext.size * 2 + w.size * 2
                      + (add.size + cls.size) * 4 + B * S * Dp * 4)

    out = pl.pallas_call(
        _embed_kernel,
        out_shape=jax.ShapeDtypeStruct((B, S, Dp), jnp.float32),
        grid=grid,
        in_specs=[
            pl.BlockSpec((1, ts, IN), lambda b, s, j: (b, s, 0)),
            pl.BlockSpec((tn, IN), lambda b, s, j: (j, 0)),
            pl.BlockSpec((1, 1, tn), lambda b, s, j: (b, 0, j)),
            pl.BlockSpec((1, 1, tn), lambda b, s, j: (b, 0, j)),
        ],
        out_specs=pl.BlockSpec((1, ts, tn), lambda b, s, j: (b, s, j)),
        compiler_params=pltpu.CompilerParams(
            dimension_semantics=("parallel", "parallel", "parallel"),
            # Let XLA fuse the patchify/pad/cast producer into input 0 so the
            # (B, S, IN) patch tensor is not separately materialized in HBM.
            allow_input_fusion=[True, False, False, False],
        ),
        cost_estimate=pl.CostEstimate(
            flops=flops, transcendentals=0, bytes_accessed=bytes_accessed),
    )(patches_ext, w, add, cls)

    return out if pad_d == 0 else out[:, :, :D]


def _reference(x, weight, bias, class_token, pos_embedding, patch_size,
               matmul_dtype=jnp.float32):
    patches = _patchify(x, patch_size).astype(matmul_dtype)
    w = weight.astype(matmul_dtype)
    proj = jnp.einsum("bni,di->bnd", patches, w,
                      preferred_element_type=jnp.float32) + bias
    out = jnp.concatenate([class_token, proj], axis=1)
    return out + pos_embedding                        # broadcast over seq dim


if __name__ == "__main__":
    # Small shapes consistent with the module: batch=2, channels=3, 16x16
    # image, patch=4 -> N=16 patches, IN=48, latent D=32.
    B, C, H, W = 2, 3, 16, 16
    patch_size = 4
    latent = 32
    in_size = patch_size * patch_size * C

    key = jax.random.PRNGKey(0)
    kx, kw, kb, kc, kp = jax.random.split(key, 5)

    x = jax.random.normal(kx, (B, C, H, W), dtype=jnp.float32)
    weight = jax.random.normal(kw, (latent, in_size), dtype=jnp.float32) * 0.02
    bias = jax.random.normal(kb, (latent,), dtype=jnp.float32) * 0.02
    class_token = jax.random.normal(kc, (B, 1, latent), dtype=jnp.float32)
    pos_embedding = jax.random.normal(kp, (B, 1, latent), dtype=jnp.float32)

    out = input_embedding(x, weight, bias, class_token, pos_embedding, patch_size)
    out = jax.block_until_ready(out)

    N = (H // patch_size) * (W // patch_size)
    assert out.shape == (B, N + 1, latent)

    # Tight check against a reference using the same bf16 matmul inputs.
    ref_bf16 = _reference(x, weight, bias, class_token, pos_embedding,
                          patch_size, matmul_dtype=jnp.bfloat16)
    assert jnp.allclose(out, ref_bf16, atol=1e-3, rtol=1e-3), "mismatch vs bf16 ref"

    # Loose check against pure-f32 module semantics (bf16 input rounding only).
    ref_f32 = _reference(x, weight, bias, class_token, pos_embedding, patch_size)
    assert jnp.allclose(out, ref_f32, atol=5e-2, rtol=5e-2), "mismatch vs f32 ref"

    print("KERNEL_OK")
</pallas_src>

<mosaic_0001>
module attributes {stable_mosaic.version = 11 : i64} {
  func.func @_embed_kernel(%arg0: i32, %arg1: i32, %arg2: i32, %arg3: memref<1x17x48xbf16, #tpu.memory_space<vmem>>, %arg4: memref<128x48xbf16, #tpu.memory_space<vmem>>, %arg5: memref<1x1x128xf32, #tpu.memory_space<vmem>>, %arg6: memref<1x1x128xf32, #tpu.memory_space<vmem>>, %arg7: memref<1x17x128xf32, #tpu.memory_space<vmem>>) attributes {dimension_semantics = [#tpu.dimension_semantics<parallel>, #tpu.dimension_semantics<parallel>, #tpu.dimension_semantics<parallel>], iteration_bounds = array<i64: 2, 1, 1>, scalar_prefetch = 0 : i64, scratch_operands = 0 : i64, tpu.core_type = #tpu.core_type<tc>, window_params = [{transform_indices = @transform_0, window_bounds = array<i64: 1, 17, 48>}, {transform_indices = @transform_1, window_bounds = array<i64: 128, 48>}, {transform_indices = @transform_2, window_bounds = array<i64: 1, 1, 128>}, {transform_indices = @transform_3, window_bounds = array<i64: 1, 1, 128>}, {transform_indices = @transform_4, window_bounds = array<i64: 1, 17, 128>}]} {
    %c0 = arith.constant 0 : index
    %c0_0 = arith.constant 0 : index
    %c0_1 = arith.constant 0 : index
    %0 = vector.load %arg3[%c0, %c0_0, %c0_1] : memref<1x17x48xbf16, #tpu.memory_space<vmem>>, vector<1x17x48xbf16>
    %1 = vector.shape_cast %0 : vector<1x17x48xbf16> to vector<17x48xbf16>
    %c0_2 = arith.constant 0 : index
    %c0_3 = arith.constant 0 : index
    %2 = vector.load %arg4[%c0_2, %c0_3] : memref<128x48xbf16, #tpu.memory_space<vmem>>, vector<128x48xbf16>
    %cst = arith.constant dense<0.000000e+00> : vector<17x128xf32>
    %3 = tpu.matmul %1, %2, %cst {dimension_numbers = #tpu.dot_dimension_numbers<[1], [1], [0], [0], [0, 0, 1, 0], [], []>} : vector<17x48xbf16>, vector<128x48xbf16>, vector<17x128xf32> -> vector<17x128xf32>
    %c0_4 = arith.constant 0 : index
    %c0_5 = arith.constant 0 : index
    %c0_6 = arith.constant 0 : index
    %4 = vector.load %arg5[%c0_4, %c0_5, %c0_6] : memref<1x1x128xf32, #tpu.memory_space<vmem>>, vector<1x1x128xf32>
    %5 = vector.shape_cast %4 : vector<1x1x128xf32> to vector<1x128xf32>
    %6 = vector.broadcast %5 : vector<1x128xf32> to vector<17x128xf32>
    %7 = arith.addf %3, %6 : vector<17x128xf32>
    %c0_7 = arith.constant 0 : index
    %c0_8 = arith.constant 0 : index
    %c0_9 = arith.constant 0 : index
    %8 = vector.load %arg7[%c0_7, %c0_8, %c0_9] : memref<1x17x128xf32, #tpu.memory_space<vmem>>, vector<1x17x128xf32>
    %9 = vector.shape_cast %8 : vector<1x17x128xf32> to vector<17x128xf32>
    %10 = vector.shape_cast %7 : vector<17x128xf32> to vector<1x17x128xf32>
    tpu.vector_store %arg7[%c0_7, %c0_8, %c0_9], %10 {strides = array<i32>} : memref<1x17x128xf32, #tpu.memory_space<vmem>>, vector<1x17x128xf32>,
    %c0_i32 = arith.constant 0 : i32
    %11 = arith.cmpi eq, %arg1, %c0_i32 : i32
    %12 = arith.extui %11 : i1 to i32
    %c0_i32_10 = arith.constant 0 : i32
    %13 = arith.cmpi ne, %12, %c0_i32_10 : i32
    scf.if %13 {
      %c0_11 = arith.constant 0 : index
      %c0_12 = arith.constant 0 : index
      %c0_13 = arith.constant 0 : index
      %14 = vector.load %arg6[%c0_11, %c0_12, %c0_13] : memref<1x1x128xf32, #tpu.memory_space<vmem>>, vector<1x1x128xf32>
      %15 = vector.shape_cast %14 : vector<1x1x128xf32> to vector<1x128xf32>
      %c0_14 = arith.constant 0 : index
      %c0_15 = arith.constant 0 : index
      %c0_16 = arith.constant 0 : index
      %16 = vector.load %arg7[%c0_14, %c0_15, %c0_16] : memref<1x17x128xf32, #tpu.memory_space<vmem>>, vector<1x1x128xf32>
      %17 = vector.shape_cast %16 : vector<1x1x128xf32> to vector<1x128xf32>
      %18 = vector.shape_cast %15 : vector<1x128xf32> to vector<1x1x128xf32>
      tpu.vector_store %arg7[%c0_14, %c0_15, %c0_16], %18 {strides = array<i32>} : memref<1x17x128xf32, #tpu.memory_space<vmem>>, vector<1x1x128xf32>,
    } else {
    }
    return
  }
  func.func @transform_0(%arg0: i32, %arg1: i32, %arg2: i32) -> (i32, i32, i32) {
    %c0_i32 = arith.constant 0 : i32
    %c0_i32_0 = arith.constant 0 : i32
    return %arg0, %arg1, %c0_i32 : i32, i32, i32
  }
  func.func @transform_1(%arg0: i32, %arg1: i32, %arg2: i32) -> (i32, i32) {
    %c0_i32 = arith.constant 0 : i32
    %c0_i32_0 = arith.constant 0 : i32
    return %arg2, %c0_i32 : i32, i32
  }
  func.func @transform_2(%arg0: i32, %arg1: i32, %arg2: i32) -> (i32, i32, i32) {
    %c0_i32 = arith.constant 0 : i32
    %c0_i32_0 = arith.constant 0 : i32
    return %arg0, %c0_i32, %arg2 : i32, i32, i32
  }
  func.func @transform_3(%arg0: i32, %arg1: i32, %arg2: i32) -> (i32, i32, i32) {
    %c0_i32 = arith.constant 0 : i32
    %c0_i32_0 = arith.constant 0 : i32
    return %arg0, %c0_i32, %arg2 : i32, i32, i32
  }
  func.func @transform_4(%arg0: i32, %arg1: i32, %arg2: i32) -> (i32, i32, i32) {
    %c0_i32 = arith.constant 0 : i32
    return %arg0, %arg1, %arg2 : i32, i32, i32
  }
}

</mosaic_0001>

<bundles_post_ra>
// kernel: tpu_custom_call.1
= control target key start
LH: loop header
LB: loop body
LE: loop exit
PB: predicated region body
PF: predicated region fallthrough
CT: control target
= control target key end

     0   :  { %s772_s15 = smov 0   ;;  %s774_s16 = smov 0   ;;  %s859_s0 = inlined_call_operand.vmem [shape: bf16[2,17,48], index: 0, kind: input, shape index: {}]   ;;  %s860_s1 = inlined_call_operand.vmem [shape: bf16[128,48], index: 1, kind: input, shape index: {}]   ;;  %s861_s2 = inlined_call_operand.vmem [shape: f32[2,1,128], index: 2, kind: input, shape index: {}]   ;;  %s862_s3 = inlined_call_operand.vmem [shape: f32[2,1,128], index: 3, kind: input, shape index: {}]   ;;  %s863_s4 = inlined_call_operand.vmem [shape: f32[2,17,128], index: 4, kind: output, shape index: {}]  }
   0x1   :  { %s776_s17 = smov 0  }
   0x2 LB: > { %s33_s18 = sadd.s32 1, %s741_s16  ;;  %p631_p0 = scmp.ge.s32.totalorder %s745_s17, 1  ;;  %s745_s17 = sphi %s776_s17, %s14_s17   ;;  %s741_s16 = sphi %s774_s16, %s865_s16   ;;  %s737_s15 = sphi %s772_s15, %s864_s15  }
   0x3   : > { %p35_p1 = scmp.ge.s32.totalorder %s33_s18, 2  ;;  %p229_p2 = scmp.lt.s32.totalorder %s745_s17, 3 }
   0x5   : > { %s867_s18 = smov (%p35_p1, %s33_s18), 0  ;;  %p230_p3 = pnand %p631_p0, %p229_p2 }
   0x6   : > { %v713_v0 = vld [vmem:[%s860_s1] sm:$0xff] (!%p230_p3)   ;;  %vm399_vm0 = vcmask (!%p230_p3), 392192   ;;  %v714_v1 = vld [vmem:[%s860_s1 + $0x8] sm:$0xff] (!%p230_p3)   ;;  %p284_p4 = scmp.lt.s32.totalorder (!%p230_p3), %s737_s15, 1  ;;  %v715_v4 = vld [vmem:[%s860_s1 + $0x10] sm:$0xff] (!%p230_p3)  }
   0x7   : > { %233 = sbr.rel (%p230_p3) target bundleno = 289 (0x121), region = 36  ;;  %679 = vmatprep.subr.msk.bf16.mxu0 (!%p230_p3), %vm399_vm0, %v713_v0  ;;  %v407_v2 = vsel (!%p230_p3), %vm399_vm0, %v713_v0, 0  ;;  %v410_v3 = vsel (!%p230_p3), %vm399_vm0, %v714_v1, 0  ;;  %v413_v6 = vsel (!%p230_p3), %vm399_vm0, %v715_v4, 0  ;;  %v716_v7 = vld [vmem:[%s860_s1 + $0x18] sm:$0xff] (!%p230_p3)   ;;  %v717_v9 = vld [vmem:[%s860_s1 + $0x20] sm:$0xff] (!%p230_p3)  }
   0x8   : > { %660 = vmatpush3.bf16.xpose.msra.mxu0 (!%p230_p3), %v407_v2  ;;  %v416_v8 = vsel (!%p230_p3), %vm399_vm0, %v716_v7, 0  ;;  %v419_v10 = vsel (!%p230_p3), %vm399_vm0, %v717_v9, 0  ;;  %v718_v11 = vld [vmem:[%s860_s1 + $0x28] sm:$0xff] (!%p230_p3)   ;;  %v719_v13 = vld [vmem:[%s860_s1 + $0x30] sm:$0xff] (!%p230_p3)   ;;  %v720_v15 = vld [vmem:[%s860_s1 + $0x38] sm:$0xff] (!%p230_p3)  }
   0x9   : > { %680 = vmatprep.subr.msk.bf16.mxu0 (!%p230_p3), %vm399_vm0, %v714_v1  ;;  %v422_v12 = vsel (!%p230_p3), %vm399_vm0, %v718_v11, 0  ;;  %v425_v14 = vsel (!%p230_p3), %vm399_vm0, %v719_v13, 0  ;;  %v428_v16 = vsel (!%p230_p3), %vm399_vm0, %v720_v15, 0 }
   0xe   : > { %s869_s15 = smov (!%p284_p4, %s737_s15), 1 }
   0xf   : > { %s687_s25 = smul.u32 12, %s869_s15  ;;  %s304_s19 = scalar_lea.vmem %s861_s2, %s869_s15 }
  0x10   : > { %662 = vmatpush3.bf16.xpose.msra.mxu0 %v410_v3  ;;  %s688_s20 = smul.u32 24, %s869_s15  ;;  %v634_v18 = vld [vmem:[%s304_s19] ss:$0 sm:$0xff]  ;;  %s310_s23 = scalar_lea.vmem %s862_s3, %s869_s15 }
  0x11   : > { %681 = vmatprep.subr.msk.bf16.mxu0 %vm399_vm0, %v715_v4  ;;  %s291_s28 = scalar_lea.vmem %s859_s0, %s687_s25  ;;  %v485_v23 = vld [vmem:[%s310_s23] sm:$0x1] }
  0x12   : > { %v721_v5 = vld [vmem:[%s291_s28] sm:$0xff]   ;;  %v722_v17 = vld [vmem:[%s291_s28 + $0x8] ss:$0 sps:$4 sm:$0x11]   ;;  %s322_s26 = scalar_lea.vmem %s863_s4, %s688_s20 }
  0x13   : > { %675 = vmatprep.mubr.msk.bf16.mxu0 %vm399_vm0, %v721_v5 }
  0x18   : > { %664 = vmatpush3.bf16.xpose.msra.mxu0 %v413_v6 }
  0x19   : > { %682 = vmatprep.subr.msk.bf16.mxu0 %vm399_vm0, %v716_v7 }
  0x20   : > { %666 = vmatpush3.bf16.xpose.msra.mxu0 %v416_v8 }
  0x21   : > { %683 = vmatprep.subr.msk.bf16.mxu0 %vm399_vm0, %v717_v9 }
  0x28   : > { %668 = vmatpush3.bf16.xpose.msra.mxu0 %v419_v10 }
  0x29   : > { %684 = vmatprep.subr.msk.bf16.mxu0 %vm399_vm0, %v718_v11 }
  0x30   : > { %670 = vmatpush3.bf16.xpose.msra.mxu0 %v422_v12 }
  0x31   : > { %685 = vmatprep.subr.msk.bf16.mxu0 %vm399_vm0, %v719_v13 }
  0x38   : > { %672 = vmatpush3.bf16.xpose.msra.mxu0 %v425_v14 }
  0x39   : > { %686 = vmatprep.subr.msk.bf16.mxu0 %vm399_vm0, %v720_v15 }
  0x40   : > { %674 = vmatpush3.bf16.xpose.msra.mxu0 %v428_v16 }
  0x47   : > { %676 = vmatmul.mubr.msk.bf16.vlgmr.msra.gmra.mrb[0].mxu0 %vm399_vm0, %v722_v17 }
 0x11a   : > { %v677_v19 = vpop.f32.mrb[0].mxu0 }
 0x11b   : > { %v473_v20 = vadd.f32 %v677_v19, %v634_v18  ;;  %v464_v21 = vpop.f32.mrb[1].mxu0 }
 0x11c   : > { %v465_v22 = vadd.f32 %v634_v18, %v464_v21  ;;  %v678_v24 = vpop.f32.mrb[2].mxu0 }
 0x11d   : > { %480 = vst [vmem:[%s322_s26 + $0x10] sm:$0x1] %v473_v20  ;;  %v467_v25 = vpop.f32.mrb[3].mxu0 }
 0x11e   : > { %478 = vst [vmem:[%s322_s26] sm:$0xff] %v465_v22  ;;  %v468_v26 = vadd.f32 %v634_v18, %v467_v25 }
 0x11f   : > { %486 = vst [vmem:[%s322_s26] sm:$0x1] %v485_v23 }
 0x120   : > { %479 = vst [vmem:[%s322_s26 + $0x8] sm:$0xff] %v468_v26 }
 0x121 PF: > { %s14_s17 = sadd.s32 1, %s745_s17   ;;  %s864_s15 = smov %s741_s16 }
 0x122   : > { %p11_p5 = scmp.ge.s32.totalorder %s14_s17, 4   ;;  %s865_s16 = smov %s867_s18 }
 0x124   :  { %13 = sbr.rel (!%p11_p5) target bundleno = 2 (0x2), region = 79 }

</bundles_post_ra>
